<compile_context>
chip_gen: v7x
topology: tpu7x:2x2x1
jax: 0.10.0
libtpu: 0.0.40
codegen_flags: <defaults>
</compile_context>

<pallas_src>
import functools

import jax
import jax.numpy as jnp
from jax import lax
from jax.experimental import pallas as pl
from jax.experimental.pallas import tpu as pltpu

# ----- static sizes implied by the PyTorch module -----
IN_CH = 3
NUM_FILTER = 8
KERNEL_SIZE = 5
INPUT_SIZE = 35
L_CONV = INPUT_SIZE - KERNEL_SIZE + 1          # 31
L_POOL = L_CONV // 2                           # 15
FC_IN = L_POOL * NUM_FILTER                    # 120
HIDDEN = 64
NUM_CLASSES = 2

X_COLS = IN_CH * INPUT_SIZE                    # 105 (flattened sample)
P_PAD = 16                                     # pooled slots per filter, 15 -> 16
HALF = NUM_FILTER * P_PAD                      # 128 lanes per (even / odd) half
CONV_PAD = 2 * HALF                            # 256 conv columns: [even | odd]


def _round_up(n, m):
    return ((n + m - 1) // m) * m


def _choose_tiling(B, max_tile=1024):
    """Pad batch to a multiple of 128; tile is a 128-multiple divisor of it.

    Prefers >= 2 grid steps (v7x megacore) and tiles <= max_tile; falls back to
    128-wide tiles for awkward batch sizes (keeps padding waste minimal)."""
    Bp = _round_up(max(B, 1), 128)
    n_units = Bp // 128
    max_units = max(max_tile // 128, 1)
    n_steps = (n_units + max_units - 1) // max_units
    if n_units >= 2:
        n_steps = max(n_steps, 2)
    while n_units % n_steps:
        n_steps += 1
    return Bp, (n_units // n_steps) * 128


def net_kernel(x_ref, wc_ref, bc_ref, w1_ref, b1_ref, w2_ref, b2_ref, out_ref):
    # x_ref block: (TILE_B, 105) bf16 — flattened samples (channel-major rows).
    x = x_ref[...]

    # conv1d folded into ONE bf16 matmul against a banded (105, 256) weight
    # whose columns are [even-t half | odd-t half]; f32 accumulation.
    conv = jnp.dot(x, wc_ref[...], preferred_element_type=jnp.float32)
    conv = jnp.maximum(conv + bc_ref[...], 0.0)                     # (TB, 256) f32

    # MaxPool1d(2): aligned 128-lane halves — no lane shift, no masking.
    pooled = jnp.maximum(conv[:, :HALF], conv[:, HALF:])            # (TB, 128) f32

    # fc1 (flatten folded into the spread (128, 64) weight) + ReLU.
    h = jnp.dot(pooled.astype(jnp.bfloat16), w1_ref[...],
                preferred_element_type=jnp.float32) + b1_ref[...]
    h = jnp.maximum(h, 0.0)                                         # (TB, 64) f32

    # fc2 producing lane-dense (2, TB) logits directly.
    logits = lax.dot_general(w2_ref[...], h.astype(jnp.bfloat16),
                             (((1,), (1,)), ((), ())),
                             preferred_element_type=jnp.float32)    # (2, TB)
    out_ref[...] = logits + b2_ref[...]


def prepare_weights(params):
    """One-time static re-layout of the PyTorch-shaped weights (pure JAX)."""
    Wc, bc, W1, b1, W2, b2 = params

    # conv (8,3,5) -> banded (105, 8, 31): wb[c*35 + t + k, f, t] = Wc[f, c, k]
    acc = 0.0
    for k in range(KERNEL_SIZE):
        shift_eye = jnp.eye(INPUT_SIZE, L_CONV, k=-k, dtype=jnp.float32)  # [t+k, t] = 1
        acc = acc + jnp.einsum('fc,st->csft', Wc[:, :, k].astype(jnp.float32), shift_eye)
    wb = acc.reshape(X_COLS, NUM_FILTER, L_CONV)

    # Even/odd conv-column split; each filter padded 15 -> 16 pooled slots.
    pad_p = ((0, 0), (0, 0), (0, P_PAD - L_POOL))
    even = jnp.pad(wb[:, :, 0:2 * L_POOL:2], pad_p).reshape(X_COLS, HALF)  # t = 0,2,...,28
    odd = jnp.pad(wb[:, :, 1:2 * L_POOL:2], pad_p).reshape(X_COLS, HALF)   # t = 1,3,...,29
    wbig = jnp.concatenate([even, odd], axis=1).astype(jnp.bfloat16)       # (105, 256)

    bc_half = jnp.pad(jnp.tile(bc.astype(jnp.float32)[:, None], (1, L_POOL)),
                      ((0, 0), (0, P_PAD - L_POOL))).reshape(1, HALF)
    bc_row = jnp.concatenate([bc_half, bc_half], axis=1)                   # (1, 256) f32

    # fc1 (64, 120) -> spread (128, 64); zero rows for each filter's pad slot.
    W1r = jnp.transpose(W1.reshape(HIDDEN, NUM_FILTER, L_POOL).astype(jnp.float32),
                        (1, 2, 0))                                         # (8, 15, 64)
    w1s = jnp.pad(W1r, ((0, 0), (0, P_PAD - L_POOL), (0, 0))
                  ).reshape(HALF, HIDDEN).astype(jnp.bfloat16)             # (128, 64)

    b1_row = b1.reshape(1, HIDDEN).astype(jnp.float32)
    w2b = W2.astype(jnp.bfloat16)                                          # (2, 64)
    b2_col = b2.reshape(NUM_CLASSES, 1).astype(jnp.float32)
    return wbig, bc_row, w1s, b1_row, w2b, b2_col


@functools.partial(jax.jit, static_argnames=("max_tile",))
def net_forward(x, prepped, max_tile=1024):
    """x: (B, 3, 35) float32.  prepped: output of prepare_weights(params)."""
    wbig, bc_row, w1s, b1_row, w2b, b2_col = prepped
    B = x.shape[0]
    Bp, tile_b = _choose_tiling(B, max_tile)

    # Flatten each sample to one 105-wide bf16 row; pad batch to Bp (multiple
    # of tile_b); padded rows are dropped on output.
    x_flat = x.reshape(B, X_COLS).astype(jnp.bfloat16)
    if Bp != B:
        x_flat = jnp.pad(x_flat, ((0, Bp - B), (0, 0)))

    flops_per_sample = 2 * (X_COLS * CONV_PAD + HALF * HIDDEN + HIDDEN * NUM_CLASSES)
    weight_bytes = 2 * (X_COLS * CONV_PAD + HALF * HIDDEN + NUM_CLASSES * HIDDEN) \
        + 4 * (CONV_PAD + HIDDEN + NUM_CLASSES)
    cost = pl.CostEstimate(
        flops=Bp * flops_per_sample,
        transcendentals=0,
        bytes_accessed=Bp * (2 * X_COLS + 4 * NUM_CLASSES) + weight_bytes,
    )

    out_t = pl.pallas_call(
        net_kernel,
        out_shape=jax.ShapeDtypeStruct((NUM_CLASSES, Bp), jnp.float32),
        grid=(Bp // tile_b,),
        in_specs=[
            pl.BlockSpec((tile_b, X_COLS), lambda b: (b, 0)),            # x tile (bf16)
            pl.BlockSpec((X_COLS, CONV_PAD), lambda b: (0, 0)),          # banded conv W (bf16)
            pl.BlockSpec((1, CONV_PAD), lambda b: (0, 0)),               # conv bias (f32)
            pl.BlockSpec((HALF, HIDDEN), lambda b: (0, 0)),              # spread fc1 W (bf16)
            pl.BlockSpec((1, HIDDEN), lambda b: (0, 0)),                 # fc1 bias (f32)
            pl.BlockSpec((NUM_CLASSES, HIDDEN), lambda b: (0, 0)),       # fc2 W (bf16)
            pl.BlockSpec((NUM_CLASSES, 1), lambda b: (0, 0)),            # fc2 bias (f32)
        ],
        out_specs=pl.BlockSpec((NUM_CLASSES, tile_b), lambda b: (0, b)),  # lane-dense
        compiler_params=pltpu.CompilerParams(
            dimension_semantics=("parallel",)),                           # batch independent
        cost_estimate=cost,
    )(x_flat, wbig, bc_row, w1s, b1_row, w2b, b2_col)

    return out_t.T[:B]                                                    # (B, 2)


def reference_forward(x, params):
    """Pure-JAX f32 reference matching PyTorch semantics exactly."""
    Wc, bc, W1, b1, W2, b2 = params
    B = x.shape[0]
    cols = jnp.stack([x[:, :, k:k + L_CONV] for k in range(KERNEL_SIZE)],
                     axis=-1)                                   # (B,3,31,5)
    conv = jnp.einsum('bctk,fck->bft', cols, Wc) + bc[None, :, None]
    conv = jnp.maximum(conv, 0.0)
    pooled = jnp.max(conv[:, :, :2 * L_POOL].reshape(B, NUM_FILTER, L_POOL, 2),
                     axis=-1)                                   # (B,8,15)
    flat = pooled.reshape(B, FC_IN)                             # (B,120) filter-major
    h = jnp.maximum(flat @ W1.T + b1, 0.0)
    return h @ W2.T + b2


def init_params(key):
    k = jax.random.split(key, 6)
    Wc = 0.1 * jax.random.normal(k[0], (NUM_FILTER, IN_CH, KERNEL_SIZE), jnp.float32)
    bc = 0.1 * jax.random.normal(k[1], (NUM_FILTER,), jnp.float32)
    W1 = 0.1 * jax.random.normal(k[2], (HIDDEN, FC_IN), jnp.float32)
    b1 = 0.1 * jax.random.normal(k[3], (HIDDEN,), jnp.float32)
    W2 = 0.1 * jax.random.normal(k[4], (NUM_CLASSES, HIDDEN), jnp.float32)
    b2 = 0.1 * jax.random.normal(k[5], (NUM_CLASSES,), jnp.float32)
    return (Wc, bc, W1, b1, W2, b2)


if __name__ == "__main__":
    key = jax.random.PRNGKey(0)
    kx, kp = jax.random.split(key)
    params = init_params(kp)
    # Weight prep is hoisted out of the per-call path (done once, reused).
    prepped = prepare_weights(params)

    # B=4: single 128-wide tile (padded); B=300: awkward size -> 3x128 tiles;
    # B=512: 2x256 tiles (>= 2 parallel steps for v7x megacore).
    for B in (4, 300, 512):
        xb = jax.random.normal(jax.random.fold_in(kx, B),
                               (B, IN_CH, INPUT_SIZE), jnp.float32)
        out = jax.block_until_ready(net_forward(xb, prepped))
        ref = reference_forward(xb, params)
        assert out.shape == (B, NUM_CLASSES)
        # bf16 matmul operands -> loosened tolerance.
        assert jnp.allclose(out, ref, atol=3e-2, rtol=3e-2), (
            B, float(jnp.max(jnp.abs(out - ref))))

    print("KERNEL_OK")
</pallas_src>

<mosaic_0001>
module attributes {stable_mosaic.version = 11 : i64} {
  func.func @net_kernel(%arg0: i32, %arg1: memref<128x105xbf16, #tpu.memory_space<vmem>>, %arg2: memref<105x256xbf16, #tpu.memory_space<vmem>>, %arg3: memref<1x256xf32, #tpu.memory_space<vmem>>, %arg4: memref<128x64xbf16, #tpu.memory_space<vmem>>, %arg5: memref<1x64xf32, #tpu.memory_space<vmem>>, %arg6: memref<2x64xbf16, #tpu.memory_space<vmem>>, %arg7: memref<2x1xf32, #tpu.memory_space<vmem>>, %arg8: memref<2x128xf32, #tpu.memory_space<vmem>>) attributes {dimension_semantics = [#tpu.dimension_semantics<parallel>], iteration_bounds = array<i64: 1>, scalar_prefetch = 0 : i64, scratch_operands = 0 : i64, tpu.core_type = #tpu.core_type<tc>, window_params = [{transform_indices = @transform_0, window_bounds = array<i64: 128, 105>}, {pipeline_mode = #tpu.pipeline_mode<synchronous>, transform_indices = @transform_1, window_bounds = array<i64: 105, 256>}, {pipeline_mode = #tpu.pipeline_mode<synchronous>, transform_indices = @transform_2, window_bounds = array<i64: 1, 256>}, {pipeline_mode = #tpu.pipeline_mode<synchronous>, transform_indices = @transform_3, window_bounds = array<i64: 128, 64>}, {pipeline_mode = #tpu.pipeline_mode<synchronous>, transform_indices = @transform_4, window_bounds = array<i64: 1, 64>}, {pipeline_mode = #tpu.pipeline_mode<synchronous>, transform_indices = @transform_5, window_bounds = array<i64: 2, 64>}, {pipeline_mode = #tpu.pipeline_mode<synchronous>, transform_indices = @transform_6, window_bounds = array<i64: 2, 1>}, {transform_indices = @transform_7, window_bounds = array<i64: 2, 128>}]} {
    %c0 = arith.constant 0 : index
    %c0_0 = arith.constant 0 : index
    %0 = vector.load %arg1[%c0, %c0_0] : memref<128x105xbf16, #tpu.memory_space<vmem>>, vector<128x105xbf16>
    %c0_1 = arith.constant 0 : index
    %c0_2 = arith.constant 0 : index
    %1 = vector.load %arg2[%c0_1, %c0_2] : memref<105x256xbf16, #tpu.memory_space<vmem>>, vector<105x256xbf16>
    %cst = arith.constant dense<0.000000e+00> : vector<128x256xf32>
    %2 = tpu.matmul %0, %1, %cst {dimension_numbers = #tpu.dot_dimension_numbers<[1], [0], [0], [1], [0, 0, 1, 1], [], []>} : vector<128x105xbf16>, vector<105x256xbf16>, vector<128x256xf32> -> vector<128x256xf32>
    %c0_3 = arith.constant 0 : index
    %c0_4 = arith.constant 0 : index
    %3 = vector.load %arg3[%c0_3, %c0_4] : memref<1x256xf32, #tpu.memory_space<vmem>>, vector<1x256xf32>
    %4 = vector.broadcast %3 : vector<1x256xf32> to vector<128x256xf32>
    %5 = arith.addf %2, %4 : vector<128x256xf32>
    %cst_5 = arith.constant 0.000000e+00 : f32
    %6 = vector.broadcast %cst_5 : f32 to vector<128x256xf32>
    %7 = arith.maximumf %5, %6 : vector<128x256xf32>
    %8 = vector.extract_strided_slice %7 {offsets = [0, 0], sizes = [128, 128], strides = [1, 1]} : vector<128x256xf32> to vector<128x128xf32>
    %9 = vector.extract_strided_slice %7 {offsets = [0, 128], sizes = [128, 128], strides = [1, 1]} : vector<128x256xf32> to vector<128x128xf32>
    %10 = arith.maximumf %8, %9 : vector<128x128xf32>
    %11 = arith.truncf %10 : vector<128x128xf32> to vector<128x128xbf16>
    %c0_6 = arith.constant 0 : index
    %c0_7 = arith.constant 0 : index
    %12 = vector.load %arg4[%c0_6, %c0_7] : memref<128x64xbf16, #tpu.memory_space<vmem>>, vector<128x64xbf16>
    %cst_8 = arith.constant dense<0.000000e+00> : vector<128x64xf32>
    %13 = tpu.matmul %11, %12, %cst_8 {dimension_numbers = #tpu.dot_dimension_numbers<[1], [0], [0], [1], [0, 0, 1, 1], [], []>} : vector<128x128xbf16>, vector<128x64xbf16>, vector<128x64xf32> -> vector<128x64xf32>
    %c0_9 = arith.constant 0 : index
    %c0_10 = arith.constant 0 : index
    %14 = vector.load %arg5[%c0_9, %c0_10] : memref<1x64xf32, #tpu.memory_space<vmem>>, vector<1x64xf32>
    %15 = vector.broadcast %14 : vector<1x64xf32> to vector<128x64xf32>
    %16 = arith.addf %13, %15 : vector<128x64xf32>
    %cst_11 = arith.constant 0.000000e+00 : f32
    %17 = vector.broadcast %cst_11 : f32 to vector<128x64xf32>
    %18 = arith.maximumf %16, %17 : vector<128x64xf32>
    %c0_12 = arith.constant 0 : index
    %c0_13 = arith.constant 0 : index
    %19 = vector.load %arg6[%c0_12, %c0_13] : memref<2x64xbf16, #tpu.memory_space<vmem>>, vector<2x64xbf16>
    %20 = arith.truncf %18 : vector<128x64xf32> to vector<128x64xbf16>
    %cst_14 = arith.constant dense<0.000000e+00> : vector<2x128xf32>
    %21 = tpu.matmul %19, %20, %cst_14 {dimension_numbers = #tpu.dot_dimension_numbers<[1], [1], [0], [0], [0, 0, 1, 0], [], []>} : vector<2x64xbf16>, vector<128x64xbf16>, vector<2x128xf32> -> vector<2x128xf32>
    %c0_15 = arith.constant 0 : index
    %c0_16 = arith.constant 0 : index
    %22 = vector.load %arg7[%c0_15, %c0_16] : memref<2x1xf32, #tpu.memory_space<vmem>>, vector<2x1xf32>
    %23 = vector.broadcast %22 : vector<2x1xf32> to vector<2x128xf32>
    %24 = arith.addf %21, %23 : vector<2x128xf32>
    %c0_17 = arith.constant 0 : index
    %c0_18 = arith.constant 0 : index
    %25 = vector.load %arg8[%c0_17, %c0_18] : memref<2x128xf32, #tpu.memory_space<vmem>>, vector<2x128xf32>
    tpu.vector_store %arg8[%c0_17, %c0_18], %24 {strides = array<i32>} : memref<2x128xf32, #tpu.memory_space<vmem>>, vector<2x128xf32>,
    return
  }
  func.func @transform_0(%arg0: i32) -> (i32, i32) {
    %c0_i32 = arith.constant 0 : i32
    %c0_i32_0 = arith.constant 0 : i32
    return %arg0, %c0_i32 : i32, i32
  }
  func.func @transform_1(%arg0: i32) -> (i32, i32) {
    %c0_i32 = arith.constant 0 : i32
    %c0_i32_0 = arith.constant 0 : i32
    %c0_i32_1 = arith.constant 0 : i32
    return %c0_i32, %c0_i32_0 : i32, i32
  }
  func.func @transform_2(%arg0: i32) -> (i32, i32) {
    %c0_i32 = arith.constant 0 : i32
    %c0_i32_0 = arith.constant 0 : i32
    %c0_i32_1 = arith.constant 0 : i32
    return %c0_i32, %c0_i32_0 : i32, i32
  }
  func.func @transform_3(%arg0: i32) -> (i32, i32) {
    %c0_i32 = arith.constant 0 : i32
    %c0_i32_0 = arith.constant 0 : i32
    %c0_i32_1 = arith.constant 0 : i32
    return %c0_i32, %c0_i32_0 : i32, i32
  }
  func.func @transform_4(%arg0: i32) -> (i32, i32) {
    %c0_i32 = arith.constant 0 : i32
    %c0_i32_0 = arith.constant 0 : i32
    %c0_i32_1 = arith.constant 0 : i32
    return %c0_i32, %c0_i32_0 : i32, i32
  }
  func.func @transform_5(%arg0: i32) -> (i32, i32) {
    %c0_i32 = arith.constant 0 : i32
    %c0_i32_0 = arith.constant 0 : i32
    %c0_i32_1 = arith.constant 0 : i32
    return %c0_i32, %c0_i32_0 : i32, i32
  }
  func.func @transform_6(%arg0: i32) -> (i32, i32) {
    %c0_i32 = arith.constant 0 : i32
    %c0_i32_0 = arith.constant 0 : i32
    %c0_i32_1 = arith.constant 0 : i32
    return %c0_i32, %c0_i32_0 : i32, i32
  }
  func.func @transform_7(%arg0: i32) -> (i32, i32) {
    %c0_i32 = arith.constant 0 : i32
    %c0_i32_0 = arith.constant 0 : i32
    return %c0_i32, %arg0 : i32, i32
  }
}

</mosaic_0001>

<bundles_post_ra>
// kernel: net_forward.1
= control target key start
LH: loop header
LB: loop body
LE: loop exit
PB: predicated region body
PF: predicated region fallthrough
CT: control target
= control target key end

     0   :  { %v848_v3 = vmov 0   ;;  %vm203_vm0 = vcmask 1043456   ;;  %vm204_vm1 = vcmask 1044480   ;;  %v849_v8 = vmov 65535   ;;  %s1096_s0 = inlined_call_operand.vmem [shape: bf16[128,105], index: 0, kind: input, shape index: {}]   ;;  %s1097_s1 = inlined_call_operand.vmem [shape: bf16[105,256], index: 1, kind: input, shape index: {}]   ;;  %s1098_s2 = inlined_call_operand.vmem [shape: f32[1,256], index: 2, kind: input, shape index: {}]   ;;  %s1099_s3 = inlined_call_operand.vmem [shape: bf16[128,64], index: 3, kind: input, shape index: {}]   ;;  %s1100_s4 = inlined_call_operand.vmem [shape: f32[1,64], index: 4, kind: input, shape index: {}]   ;;  %s1101_s5 = inlined_call_operand.vmem [shape: bf16[2,64], index: 5, kind: input, shape index: {}]   ;;  %s1102_s6 = inlined_call_operand.vmem [shape: f32[2,1], index: 6, kind: input, shape index: {}]   ;;  %s1103_s7 = inlined_call_operand.hbm [shape: f32[2,128], index: 7, kind: output, shape index: {}]  }
   0x1   :  { %v787_v0 = vld [vmem:[%s1097_s1 + $0x4] ss:$8 sps:$4 sm:$0xff]   ;;  %v789_v1 = vld [vmem:[%s1097_s1] ss:$8 sps:$4 sm:$0xff]   ;;  %v790_v2 = vld [vmem:[%s1097_s1 + $0x14] ss:$8 sps:$4 sm:$0xff]   ;;  %245 = vmatprep.mubr.bf16.mxu0 %v848_v3  ;;  %786 = vset.pattern.permute.xlu0 %v848_v3 }
   0x2   :  { %213 = vmatprep.subr.bf16.mxu0 %v787_v0  ;;  %v792_v4 = vld [vmem:[%s1097_s1 + $0x10] ss:$8 sps:$4 sm:$0xff]   ;;  %v793_v5 = vld [vmem:[%s1097_s1 + $0x24] ss:$8 sps:$4 sm:$0xff]   ;;  %v795_v6 = vld [vmem:[%s1097_s1 + $0x20] ss:$8 sps:$4 sm:$0xff]  }
   0x3   :  { %214 = vmatpush1.bf16.msra.mxu0 %v789_v1  ;;  %v796_v7 = vld [vmem:[%s1097_s1 + $0x34] ss:$8 sps:$4 sm:$0xff]   ;;  %v205_v9 = vsel %vm203_vm0, 4294967295, %v849_v8  ;;  %v798_v10 = vld [vmem:[%s1097_s1 + $0x30] ss:$8 sps:$4 sm:$0xff]   ;;  %v816_v18 = vld [vmem:[%s1099_s3] sm:$0xff]  }
   0x4   :  { %215 = vmatprep.subr.bf16.mxu0 %v790_v2  ;;  %v799_v11 = vld [vmem:[%s1097_s1 + $0x44] ss:$8 sps:$4 sm:$0xff]   ;;  %v206_v13 = vsel %vm204_vm1, %v205_v9, 0  ;;  %v801_v14 = vld [vmem:[%s1097_s1 + $0x40] ss:$8 sps:$4 sm:$0xff]   ;;  %729 = vmatprep.subr.bf16.mxu1 %v816_v18  ;;  %v818_v21 = vld [vmem:[%s1099_s3 + $0x10] sm:$0xff]  }
   0x5   :  { %v805_v12 = vld [vmem:[%s1097_s1 + $0x64] ss:$8 sps:$4 sm:$0x1f]   ;;  %v802_v15 = vld [vmem:[%s1097_s1 + $0x54] ss:$8 sps:$4 sm:$0xff]   ;;  %730 = vmatpush3.bf16.msra.mxu1 %v816_v18 }
   0x6   :  { %v804_v16 = vld [vmem:[%s1097_s1 + $0x50] ss:$8 sps:$4 sm:$0xff]   ;;  %v807_v17 = vld [vmem:[%s1097_s1 + $0x60] ss:$8 sps:$4 sm:$0x1f]   ;;  %v211_v20 = vand.u32 %v805_v12, %v206_v13 }
   0x7   :  { %216 = vmatpush1.bf16.msra.mxu0 %v792_v4  ;;  %v817_v19 = vld [vmem:[%s1099_s3 + $0x8] sm:$0xff]   ;;  %v208_v22 = vand.u32 %v807_v17, %v206_v13 }
   0x8   :  { %217 = vmatprep.subr.bf16.mxu0 %v793_v5  ;;  %731 = vmatprep.subr.bf16.mxu1 %v817_v19 }
   0xb   :  { %218 = vmatpush1.bf16.msra.mxu0 %v795_v6 }
   0xc   :  { %219 = vmatprep.subr.bf16.mxu0 %v796_v7 }
   0xf   :  { %220 = vmatpush1.bf16.msra.mxu0 %v798_v10 }
  0x10   :  { %221 = vmatprep.subr.bf16.mxu0 %v799_v11 }
  0x13   :  { %222 = vmatpush1.bf16.msra.mxu0 %v801_v14 }
  0x14   :  { %223 = vmatprep.subr.bf16.mxu0 %v802_v15 }
  0x17   :  { %224 = vmatpush1.bf16.msra.mxu0 %v804_v16 }
  0x18   :  { %225 = vmatprep.subr.bf16.mxu0 %v211_v20 }
  0x19   :  { %12 = vsyncpa [#allocation3], 0  ;;  %732 = vmatpush3.bf16.msra.mxu1 %v817_v19  ;;  %v808_v23 = vld [vmem:[%s1096_s0] sm:$0xff]   ;;  %vm178_vm2 = vcmask 859136   ;;  %v809_v24 = vld [vmem:[%s1096_s0 + $0x8] sm:$0xff]   ;;  %v60_v36 = vlaneseq  ;;  %vm851_vm3 = vmmov 0  }
  0x1a   :  { %733 = vmatprep.subr.bf16.mxu1 %v818_v21  ;;  %v810_v25 = vld [vmem:[%s1096_s0 + $0x10] sm:$0xff]   ;;  %v811_v26 = vld [vmem:[%s1096_s0 + $0x18] sm:$0xff]   ;;  %v812_v27 = vld [vmem:[%s1096_s0 + $0x20] sm:$0xff]   ;;  %vm581_vm4 = vcmask 523264   ;;  %s852_s16 = smov [#allocation2]  }
  0x1b   :  { %226 = vmatpush1.bf16.msra.mxu0 %v208_v22  ;;  %v813_v28 = vld [vmem:[%s1096_s0 + $0x28] sm:$0xff]   ;;  %v814_v29 = vld [vmem:[%s1096_s0 + $0x30] sm:$0xff]   ;;  %v815_v30 = vld [vmem:[%s1096_s0 + $0x38] sm:$0xff]   ;;  %v61_v37 = vshrl.u32 %v60_v36, 7  ;;  %s656_s17 = sshll.u32 %s852_s16, 4  ;;  %s657_s17 = int_to_ptr.vmem [resolvable:$true] %s656_s17 }
  0x1c   :  { %v819_v31 = vld [vmem:[%s1099_s3 + $0x18] sm:$0xff]   ;;  %v820_v32 = vld [vmem:[%s1099_s3 + $0x20] sm:$0xff]   ;;  %v821_v33 = vld [vmem:[%s1099_s3 + $0x28] sm:$0xff]   ;;  %s824_s18 = scalar_lea.vmem %s657_s17, 32  ;;  %p829_p1 = scmp.lt.s32.totalorder %s657_s17, %s657_s17 }
  0x1d   :  { %734 = vmatpush3.bf16.msra.mxu1 %v818_v21  ;;  %v822_v34 = vld [vmem:[%s1099_s3 + $0x30] sm:$0xff]   ;;  %v823_v35 = vld [vmem:[%s1099_s3 + $0x38] sm:$0xff]   ;;  %v62_v38 = vsub.s32 0, %v61_v37  ;;  %v58_v39 = vld [vmem:[%s1098_s2] sm:$0x3]  ;;  %v66_v40 = vsub.s32 1, %v61_v37  ;;  %p825_p0 = scmp.ne.s32.totalorder %s657_s17, %s824_s18  ;;  %p830_p2 = scmp.lt.s32.totalorder %s824_s18, %s824_s18 }
  0x1e   :  { %686 = vmatmul.mubr.msk.bf16.vlgmr.msra.gmra.mrb[0].mxu0 %vm178_vm2, %v808_v23  ;;  %735 = vmatprep.subr.bf16.mxu1 %v819_v31 }
  0x1f   :  { %255 = vmatprep.mubr.bf16.mxu0 %v848_v3  ;;  %v1003_v41 = vrot.slane %v58_v39, %v62_v38  ;;  %v1005_v42 = vrot.slane %v58_v39, %v66_v40  ;;  %p831_p3 = por %p830_p2, %p829_p1 }
  0x21   :  { %736 = vmatpush3.bf16.msra.mxu1 %v819_v31  ;;  %p832_p4 = pnand %p831_p3, %p825_p0 }
  0x22   :  { %737 = vmatprep.subr.bf16.mxu1 %v820_v32 }
  0x25   :  { %738 = vmatpush3.bf16.msra.mxu1 %v820_v32 }
  0x26   :  { %687 = vmatmul.mubr.msk.bf16.gmra.mrb[4].mxu0 %vm178_vm2, %v809_v24  ;;  %739 = vmatprep.subr.bf16.mxu1 %v821_v33 }
  0x27   :  { %265 = vmatprep.mubr.bf16.mxu0 %v848_v3 }
  0x29   :  { %740 = vmatpush3.bf16.msra.mxu1 %v821_v33 }
  0x2a   :  { %741 = vmatprep.subr.bf16.mxu1 %v822_v34 }
  0x2d   :  { %742 = vmatpush3.bf16.msra.mxu1 %v822_v34 }
  0x2e   :  { %688 = vmatmul.mubr.msk.bf16.gmra.mrb[8].mxu0 %vm178_vm2, %v810_v25  ;;  %743 = vmatprep.subr.bf16.mxu1 %v823_v35 }
  0x2f   :  { %275 = vmatprep.mubr.bf16.mxu0 %v848_v3 }
  0x31   :  { %744 = vmatpush3.bf16.msra.mxu1 %v823_v35 }
  0x36   :  { %689 = vmatmul.mubr.msk.bf16.gmra.mrb[12].mxu0 %vm178_vm2, %v811_v26 }
  0x37   :  { %285 = vmatprep.mubr.bf16.mxu0 %v848_v3 }
  0x3e   :  { %690 = vmatmul.mubr.msk.bf16.gmra.mrb[16].mxu0 %vm178_vm2, %v812_v27 }
  0x3f   :  { %295 = vmatprep.mubr.bf16.mxu0 %v848_v3 }
  0x46   :  { %691 = vmatmul.mubr.msk.bf16.gmra.mrb[20].mxu0 %vm178_vm2, %v813_v28 }
  0x47   :  { %305 = vmatprep.mubr.bf16.mxu0 %v848_v3 }
  0x4e   :  { %692 = vmatmul.mubr.msk.bf16.gmra.mrb[24].mxu0 %vm178_vm2, %v814_v29 }
  0x4f   :  { %315 = vmatprep.mubr.bf16.mxu0 %v848_v3 }
  0x56   :  { %693 = vmatmul.mubr.msk.bf16.gmra.mrb[28].mxu0 %vm178_vm2, %v815_v30 }
  0xf1   :  { %v247_v43 = vpop.f32.mrb[0].mxu0 }
  0xf2   :  { %v248_v44 = vadd.f32 %v247_v43, %v1003_v41  ;;  %v249_v45 = vpop.f32.mrb[1].mxu0 }
  0xf3   :  { %v250_v46 = vadd.f32 %v249_v45, %v1005_v42  ;;  %v251_v47 = vpop.f32.mrb[2].mxu0 }
  0xf4   :  { %v326_v48 = vmax.f32 %v248_v44, 0.0  ;;  %v252_v49 = vadd.f32 %v251_v47, %v1003_v41  ;;  %v253_v50 = vpop.f32.mrb[3].mxu0 }
  0xf5   :  { %v327_v51 = vmax.f32 %v250_v46, 0.0  ;;  %v254_v52 = vadd.f32 %v253_v50, %v1005_v42 }
  0xf6   :  { %v328_v53 = vmax.f32 %v252_v49, 0.0 }
  0xf7   :  { %v329_v54 = vmax.f32 %v254_v52, 0.0  ;;  %v358_v55 = vmax.f32 %v326_v48, %v327_v51 }
  0xf9   :  { %v257_v56 = vpop.f32.mrb[4].mxu0  ;;  %v359_v57 = vmax.f32 %v328_v53, %v329_v54 }
  0xfa   :  { %v258_v58 = vadd.f32 %v257_v56, %v1003_v41  ;;  %v259_v59 = vpop.f32.mrb[5].mxu0 }
  0xfb   :  { %v260_v60 = vadd.f32 %v259_v59, %v1005_v42  ;;  %v261_v61 = vpop.f32.mrb[6].mxu0  ;;  %v374_v62 = vpack.c.bf16 %v359_v57, %v358_v55 }
  0xfc   :  { %v330_v63 = vmax.f32 %v258_v58, 0.0  ;;  %v262_v0 = vadd.f32 %v261_v61, %v1003_v41  ;;  %v263_v1 = vpop.f32.mrb[7].mxu0 }
  0xfd   :  { %v331_v2 = vmax.f32 %v260_v60, 0.0  ;;  %v264_v3 = vadd.f32 %v263_v1, %v1005_v42  ;;  %745 = vmatprep.mubr.bf16.mxu1 %v374_v62 }
  0xfe   :  { %v332_v4 = vmax.f32 %v262_v0, 0.0 }
  0xff   :  { %v360_v5 = vmax.f32 %v330_v63, %v331_v2  ;;  %v333_v6 = vmax.f32 %v264_v3, 0.0 }
 0x101   :  { %v361_v7 = vmax.f32 %v332_v4, %v333_v6  ;;  %v267_v8 = vpop.f32.mrb[8].mxu0 }
 0x102   :  { %v268_v9 = vadd.f32 %v267_v8, %v1003_v41  ;;  %v269_v10 = vpop.f32.mrb[9].mxu0 }
 0x103   :  { %v270_v11 = vadd.f32 %v269_v10, %v1005_v42  ;;  %v271_v12 = vpop.f32.mrb[10].mxu0  ;;  %v375_v13 = vpack.c.bf16 %v361_v7, %v360_v5 }
 0x104   :  { %v334_v14 = vmax.f32 %v268_v9, 0.0  ;;  %v272_v15 = vadd.f32 %v271_v12, %v1003_v41  ;;  %v273_v16 = vpop.f32.mrb[11].mxu0 }
 0x105   :  { %v335_v17 = vmax.f32 %v270_v11, 0.0  ;;  %v274_v18 = vadd.f32 %v273_v16, %v1005_v42  ;;  %746 = vmatmul.mubr.bf16.vlgmr.msra.gmra.mrb[0].mxu1 %v375_v13 }
 0x106   :  { %v336_v19 = vmax.f32 %v272_v15, 0.0 }
 0x107   :  { %v362_v20 = vmax.f32 %v334_v14, %v335_v17  ;;  %v337_v21 = vmax.f32 %v274_v18, 0.0 }
 0x109   :  { %v363_v22 = vmax.f32 %v336_v19, %v337_v21  ;;  %v277_v23 = vpop.f32.mrb[12].mxu0 }
 0x10a   :  { %v278_v24 = vadd.f32 %v277_v23, %v1003_v41  ;;  %v279_v25 = vpop.f32.mrb[13].mxu0 }
 0x10b   :  { %v280_v26 = vadd.f32 %v279_v25, %v1005_v42  ;;  %v281_v27 = vpop.f32.mrb[14].mxu0  ;;  %v376_v28 = vpack.c.bf16 %v363_v22, %v362_v20 }
 0x10c   :  { %v338_v29 = vmax.f32 %v278_v24, 0.0  ;;  %v282_v30 = vadd.f32 %v281_v27, %v1003_v41  ;;  %v283_v31 = vpop.f32.mrb[15].mxu0 }
 0x10d   :  { %v339_v32 = vmax.f32 %v280_v26, 0.0  ;;  %v284_v33 = vadd.f32 %v283_v31, %v1005_v42  ;;  %749 = vmatprep.mubr.bf16.mxu1 %v376_v28 }
 0x10e   :  { %v340_v34 = vmax.f32 %v282_v30, 0.0 }
 0x10f   :  { %v364_v35 = vmax.f32 %v338_v29, %v339_v32  ;;  %v341_v36 = vmax.f32 %v284_v33, 0.0 }
 0x111   :  { %v365_v37 = vmax.f32 %v340_v34, %v341_v36  ;;  %v287_v38 = vpop.f32.mrb[16].mxu0 }
 0x112   :  { %v288_v39 = vadd.f32 %v287_v38, %v1003_v41  ;;  %v289_v40 = vpop.f32.mrb[17].mxu0 }
 0x113   :  { %v290_v43 = vadd.f32 %v289_v40, %v1005_v42  ;;  %v291_v44 = vpop.f32.mrb[18].mxu0  ;;  %v377_v45 = vpack.c.bf16 %v365_v37, %v364_v35  ;;  %v850_v37 = vmov 0.0  }
 0x114   :  { %v342_v46 = vmax.f32 %v288_v39, 0.0  ;;  %v292_v47 = vadd.f32 %v291_v44, %v1003_v41  ;;  %v293_v48 = vpop.f32.mrb[19].mxu0  ;;  %761 = vmatprep.subr.bf16.mxu0 %v850_v37  ;;  %777 = vmatprep.mubr.msk.bf16.mxu0 %vm851_vm3, %v850_v37 }
 0x115   :  { %v343_v49 = vmax.f32 %v290_v43, 0.0  ;;  %v294_v50 = vadd.f32 %v293_v48, %v1005_v42  ;;  %750 = vmatmul.mubr.bf16.gmra.mrb[4].mxu1 %v377_v45 }
 0x116   :  { %v344_v51 = vmax.f32 %v292_v47, 0.0 }
 0x117   :  { %v366_v52 = vmax.f32 %v342_v46, %v343_v49  ;;  %v345_v53 = vmax.f32 %v294_v50, 0.0 }
 0x119   :  { %v367_v54 = vmax.f32 %v344_v51, %v345_v53  ;;  %v297_v55 = vpop.f32.mrb[20].mxu0 }
 0x11a   :  { %v298_v56 = vadd.f32 %v297_v55, %v1003_v41  ;;  %v299_v57 = vpop.f32.mrb[21].mxu0 }
 0x11b   :  { %v300_v58 = vadd.f32 %v299_v57, %v1005_v42  ;;  %v301_v59 = vpop.f32.mrb[22].mxu0  ;;  %v378_v60 = vpack.c.bf16 %v367_v54, %v366_v52 }
 0x11c   :  { %v346_v61 = vmax.f32 %v298_v56, 0.0  ;;  %v302_v62 = vadd.f32 %v301_v59, %v1003_v41  ;;  %v303_v63 = vpop.f32.mrb[23].mxu0 }
 0x11d   :  { %v347_v0 = vmax.f32 %v300_v58, 0.0  ;;  %v304_v1 = vadd.f32 %v303_v63, %v1005_v42  ;;  %753 = vmatprep.mubr.bf16.mxu1 %v378_v60 }
 0x11e   :  { %v348_v2 = vmax.f32 %v302_v62, 0.0 }
 0x11f   :  { %v368_v3 = vmax.f32 %v346_v61, %v347_v0  ;;  %v349_v4 = vmax.f32 %v304_v1, 0.0 }
 0x121   :  { %v369_v5 = vmax.f32 %v348_v2, %v349_v4  ;;  %v307_v6 = vpop.f32.mrb[24].mxu0 }
 0x122   :  { %v308_v7 = vadd.f32 %v307_v6, %v1003_v41  ;;  %v309_v8 = vpop.f32.mrb[25].mxu0 }
 0x123   :  { %v310_v9 = vadd.f32 %v309_v8, %v1005_v42  ;;  %v311_v10 = vpop.f32.mrb[26].mxu0  ;;  %v379_v11 = vpack.c.bf16 %v369_v5, %v368_v3 }
 0x124   :  { %v350_v12 = vmax.f32 %v308_v7, 0.0  ;;  %v312_v13 = vadd.f32 %v311_v10, %v1003_v41  ;;  %v313_v14 = vpop.f32.mrb[27].mxu0 }
 0x125   :  { %v351_v15 = vmax.f32 %v310_v9, 0.0  ;;  %v314_v16 = vadd.f32 %v313_v14, %v1005_v42  ;;  %754 = vmatmul.mubr.bf16.gmra.mrb[8].mxu1 %v379_v11 }
 0x126   :  { %v352_v17 = vmax.f32 %v312_v13, 0.0 }
 0x127   :  { %v370_v18 = vmax.f32 %v350_v12, %v351_v15  ;;  %v353_v19 = vmax.f32 %v314_v16, 0.0 }
 0x129   :  { %v371_v20 = vmax.f32 %v352_v17, %v353_v19  ;;  %v317_v21 = vpop.f32.mrb[28].mxu0 }
 0x12a   :  { %v318_v22 = vadd.f32 %v317_v21, %v1003_v41  ;;  %v319_v23 = vpop.f32.mrb[29].mxu0 }
 0x12b   :  { %v320_v24 = vadd.f32 %v319_v23, %v1005_v42  ;;  %v321_v25 = vpop.f32.mrb[30].mxu0  ;;  %v380_v26 = vpack.c.bf16 %v371_v20, %v370_v18 }
 0x12c   :  { %v354_v27 = vmax.f32 %v318_v22, 0.0  ;;  %v322_v28 = vadd.f32 %v321_v25, %v1003_v41  ;;  %v323_v29 = vpop.f32.mrb[31].mxu0  ;;  %v575_v41 = vld [vmem:[%s1102_s6] sm:$0x3] }
 0x12d   :  { %v355_v30 = vmax.f32 %v320_v24, 0.0  ;;  %v324_v31 = vadd.f32 %v323_v29, %v1005_v42  ;;  %757 = vmatprep.mubr.bf16.mxu1 %v380_v26  ;;  %578 = vperm.xlu0 %786, %v575_v41   ;;  %v1047_v42 = vld [vmem:[%s1100_s4] ss:$0 sm:$0xff] }
 0x12e   :  { %v356_v32 = vmax.f32 %v322_v28, 0.0 }
 0x12f   :  { %v372_v33 = vmax.f32 %v354_v27, %v355_v30  ;;  %v357_v34 = vmax.f32 %v324_v31, 0.0 }
 0x131   :  { %v373_v35 = vmax.f32 %v356_v32, %v357_v34 }
 0x133   :  { %v381_v36 = vpack.c.bf16 %v373_v35, %v372_v33 }
 0x135   :  { %758 = vmatmul.mubr.bf16.gmra.mrb[12].mxu1 %v381_v36 }
 0x1d8   :  { %v747_v38 = vpop.f32.mrb[0].mxu1 }
 0x1d9   :  { %v496_v39 = vadd.f32 %v747_v38, %v1047_v42  ;;  %v487_v40 = vpop.f32.mrb[1].mxu1 }
 0x1da   :  { %v488_v43 = vadd.f32 %v1047_v42, %v487_v40  ;;  %v748_v44 = vpop.f32.mrb[2].mxu1  ;;  %v579_v40 = vpop.permute.xlu0 %578 }
 0x1db   :  { %v499_v45 = vadd.f32 %v748_v44, %v1047_v42  ;;  %v490_v46 = vpop.f32.mrb[3].mxu1  ;;  %v552_v48 = vmax.f32 %v496_v39, 0.0 }
 0x1dc   :  { %v491_v47 = vadd.f32 %v1047_v42, %v490_v46  ;;  %v550_v50 = vmax.f32 %v488_v43, 0.0 }
 0x1dd   :  { %v553_v49 = vmax.f32 %v499_v45, 0.0 }
 0x1de   :  { %v551_v51 = vmax.f32 %v491_v47, 0.0 }
 0x1df   :  { %v568_v52 = vpack.c.bf16 %v553_v49, %v552_v48 }
 0x1e0   :  { %v567_v53 = vpack.c.bf16 %v551_v51, %v550_v50 }
 0x1e1   :  { %v589_v60 = vsel %vm581_vm4, %v568_v52, 0 }
 0x1e2   :  { %v586_v54 = vsel %vm581_vm4, %v567_v53, 0 }
 0x1e3   :  { %762 = vmatpush3.bf16.xpose.msra.mxu0 %v586_v54 }
 0x1e4   :  { %763 = vmatprep.subr.bf16.mxu0 %v850_v37 }
 0x1e8   :  { %v751_v55 = vpop.f32.mrb[4].mxu1 }
 0x1e9   :  { %v512_v56 = vadd.f32 %v751_v55, %v1047_v42  ;;  %v503_v57 = vpop.f32.mrb[5].mxu1 }
 0x1ea   :  { %v504_v58 = vadd.f32 %v1047_v42, %v503_v57  ;;  %v752_v59 = vpop.f32.mrb[6].mxu1 }
 0x1eb   :  { %v515_v61 = vadd.f32 %v752_v59, %v1047_v42  ;;  %v506_v62 = vpop.f32.mrb[7].mxu1  ;;  %764 = vmatpush3.bf16.xpose.msra.mxu0 %v589_v60  ;;  %v556_v0 = vmax.f32 %v512_v56, 0.0 }
 0x1ec   :  { %v507_v63 = vadd.f32 %v1047_v42, %v506_v62  ;;  %765 = vmatprep.subr.bf16.mxu0 %v850_v37  ;;  %v554_v2 = vmax.f32 %v504_v58, 0.0 }
 0x1ed   :  { %v557_v1 = vmax.f32 %v515_v61, 0.0 }
 0x1ee   :  { %v555_v3 = vmax.f32 %v507_v63, 0.0 }
 0x1ef   :  { %v570_v4 = vpack.c.bf16 %v557_v1, %v556_v0 }
 0x1f0   :  { %v569_v5 = vpack.c.bf16 %v555_v3, %v554_v2 }
 0x1f1   :  { %v595_v12 = vsel %vm581_vm4, %v570_v4, 0 }
 0x1f2   :  { %v592_v6 = vsel %vm581_vm4, %v569_v5, 0 }
 0x1f3   :  { %766 = vmatpush3.bf16.xpose.msra.mxu0 %v592_v6 }
 0x1f4   :  { %767 = vmatprep.subr.bf16.mxu0 %v850_v37 }
 0x1f8   :  { %v755_v7 = vpop.f32.mrb[8].mxu1 }
 0x1f9   :  { %v528_v8 = vadd.f32 %v755_v7, %v1047_v42  ;;  %v519_v9 = vpop.f32.mrb[9].mxu1 }
 0x1fa   :  { %v520_v10 = vadd.f32 %v1047_v42, %v519_v9  ;;  %v756_v11 = vpop.f32.mrb[10].mxu1 }
 0x1fb   :  { %v531_v13 = vadd.f32 %v756_v11, %v1047_v42  ;;  %v522_v14 = vpop.f32.mrb[11].mxu1  ;;  %768 = vmatpush3.bf16.xpose.msra.mxu0 %v595_v12  ;;  %v560_v16 = vmax.f32 %v528_v8, 0.0 }
 0x1fc   :  { %v523_v15 = vadd.f32 %v1047_v42, %v522_v14  ;;  %769 = vmatprep.subr.bf16.mxu0 %v850_v37  ;;  %v558_v18 = vmax.f32 %v520_v10, 0.0 }
 0x1fd   :  { %v561_v17 = vmax.f32 %v531_v13, 0.0 }
 0x1fe   :  { %v559_v19 = vmax.f32 %v523_v15, 0.0 }
 0x1ff   :  { %v572_v20 = vpack.c.bf16 %v561_v17, %v560_v16 }
 0x200   :  { %v571_v21 = vpack.c.bf16 %v559_v19, %v558_v18 }
 0x201   :  { %v601_v28 = vsel %vm581_vm4, %v572_v20, 0 }
 0x202   :  { %v598_v22 = vsel %vm581_vm4, %v571_v21, 0 }
 0x203   :  { %770 = vmatpush3.bf16.xpose.msra.mxu0 %v598_v22 }
 0x204   :  { %771 = vmatprep.subr.bf16.mxu0 %v850_v37 }
 0x208   :  { %v759_v23 = vpop.f32.mrb[12].mxu1 }
 0x209   :  { %v544_v24 = vadd.f32 %v759_v23, %v1047_v42  ;;  %v535_v25 = vpop.f32.mrb[13].mxu1 }
 0x20a   :  { %v536_v26 = vadd.f32 %v1047_v42, %v535_v25  ;;  %v760_v27 = vpop.f32.mrb[14].mxu1 }
 0x20b   :  { %v547_v29 = vadd.f32 %v760_v27, %v1047_v42  ;;  %v538_v30 = vpop.f32.mrb[15].mxu1  ;;  %772 = vmatpush3.bf16.xpose.msra.mxu0 %v601_v28  ;;  %v564_v32 = vmax.f32 %v544_v24, 0.0 }
 0x20c   :  { %v539_v31 = vadd.f32 %v1047_v42, %v538_v30  ;;  %773 = vmatprep.subr.bf16.mxu0 %v850_v37  ;;  %v562_v34 = vmax.f32 %v536_v26, 0.0  ;;  %v566_v42 = vld [vmem:[%s1101_s5] sm:$0x1] }
 0x20d   :  { %v565_v33 = vmax.f32 %v547_v29, 0.0 }
 0x20e   :  { %v563_v35 = vmax.f32 %v539_v31, 0.0 }
 0x20f   :  { %v574_v36 = vpack.c.bf16 %v565_v33, %v564_v32 }
 0x210   :  { %v573_v41 = vpack.c.bf16 %v563_v35, %v562_v34 }
 0x211   :  { %v607_v39 = vsel %vm581_vm4, %v574_v36, 0 }
 0x212   :  { %v604_v38 = vsel %vm581_vm4, %v573_v41, 0 }
 0x213   :  { %774 = vmatpush3.bf16.xpose.msra.mxu0 %v604_v38 }
 0x214   :  { %775 = vmatprep.subr.bf16.mxu0 %v850_v37 }
 0x21b   :  { %776 = vmatpush3.bf16.xpose.msra.mxu0 %v607_v39 }
 0x222   :  { %778 = vmatmul.mubr.msk.bf16.vlgmr.msra.gmra.mrb[32].mxu0 %vm581_vm4, %v566_v42 }
 0x2f5   :  { %v643_v43 = vpop.f32.mrb[32].mxu0 }
 0x2f6   :  { %v644_v44 = vadd.f32 %v643_v43, %v579_v40  ;;  %v779_v45 = vpop.f32.mrb[33].mxu0 }
 0x2f7   :  { %v646_v46 = vpop.f32.mrb[34].mxu0 }
 0x2f8   :  { %649 = vst [vmem:[#allocation2] sm:$0x3] %v644_v44  ;;  %v780_v47 = vpop.f32.mrb[35].mxu0 }
 0x2f9   :  { %835 = shalt.err (!%p832_p4)
}
 0x2fa   :  { %s836_s20 = scalar_lea.hbm %s1103_s7, 32 }
 0x2fb   :  { %p837_p5 = scmp.ne.s32.totalorder %s1103_s7, %s836_s20  ;;  %p840_p6 = scmp.lt.u32.totalorder %s836_s20, %s1103_s7 }
 0x2fd   :  { %p842_p7 = pnand %p840_p6, %p837_p5 }
 0x2ff   :  { %845 = shalt.err (!%p842_p7)
}
 0x300   :  { %659 = dma.vmem_to_hbm [thread:$0]  %s657_s17, 32, %s1103_s7, [#allocation3]  }
 0x301   :  { %846 = dma.done.wait [#allocation3], 32  }
 0x302   :  { %847 = vsyncadd [#allocation3], 4294967264 }
 0x303   :  { %663 = vsyncpa [#allocation3], 1 }

</bundles_post_ra>
